<compile_context>
chip_gen: v7x
topology: tpu7x:2x2x1
jax: 0.10.0
libtpu: 0.0.40
codegen_flags: <defaults>
</compile_context>

<pallas_src>
import functools

import jax
import jax.numpy as jnp
from jax.experimental import pallas as pl
from jax.experimental.pallas import tpu as pltpu

LANE = 128
ACC_ROWS = 32                      # widened f32 accumulator (4 vregs)
TARGET_TILE_BYTES = 4 * 1024 * 1024  # ~4 MiB streamed per grid step


def _round_up(x, m):
    return ((x + m - 1) // m) * m


def _device_kind():
    try:
        return jax.devices()[0].device_kind.lower()
    except Exception:
        return ""


def _num_core_splits():
    # v7x has two TensorCores per chip; the other Pallas TPU targets have one.
    return 2 if "7" in _device_kind() else 1


def _has_bf16_valu():
    # bf16 VALU math exists on v6e (Trillium) and newer; v5e and older do not.
    kind = _device_kind()
    if not kind:
        return False
    return not any(old in kind for old in ("v2", "v3", "v4", "v5"))


def _apply_alpha(t, alpha):
    """t**alpha with an integer-alpha fast path (VPU multiplies only)."""
    a = float(alpha)
    if a == int(a) and 0 <= int(a) <= 64:
        p = int(a)
        if p == 0:
            return jnp.ones_like(t)
        result = None
        base = t
        while p:
            if p & 1:
                result = base if result is None else result * base
            p >>= 1
            if p:
                base = base * base
        return result
    # Non-integer alpha: general pow (lowers to exp/log on the EUP).
    # TODO(synk): alpha <= 0 with exact-zero silhouettes is inf/NaN here (same
    # as the generic pow in any framework).
    return t ** jnp.float32(a)


def _opacity_sum_kernel(x_ref, out_ref, acc_ref, *, alpha, rows, block_rows,
                        blocks_per_core, acc_rows, native_math):
    """Per-core partial sum of (s*(1-s))**alpha over a [rows, 128] slab."""
    c = pl.program_id(0)   # core split (parallel)
    i = pl.program_id(1)   # streaming / reduction axis (arbitrary, innermost)

    @pl.when(i == 0)
    def _():
        acc_ref[...] = jnp.zeros_like(acc_ref)

    global_block = c * blocks_per_core + i
    row0 = global_block * block_rows

    s = x_ref[...]
    if not native_math:
        s = s.astype(jnp.float32)
    v = _apply_alpha(s * (1.0 - s), alpha).astype(jnp.float32)

    # Fast path (all blocks except a possibly-ragged last one): no masking,
    # lane-parallel accumulation into 4 independent (8,128) add chains.
    @pl.when(row0 + block_rows <= rows)
    def _():
        acc_ref[...] += jnp.sum(v.reshape(-1, acc_rows, LANE), axis=0)

    # Ragged last block of the slab: select-mask rows past the end (select,
    # not multiply, so garbage NaN/Inf from undefined VMEM rows is discarded).
    @pl.when(jnp.logical_and(row0 < rows, row0 + block_rows > rows))
    def _():
        row_idx = jax.lax.broadcasted_iota(jnp.int32, v.shape, 0) + row0
        vm = jnp.where(row_idx < rows, v, 0.0)
        acc_ref[...] += jnp.sum(vm.reshape(-1, acc_rows, LANE), axis=0)

    # Fully out-of-range blocks (uneven core split) accumulate nothing.

    @pl.when(i == pl.num_programs(1) - 1)
    def _():
        out_ref[0, 0] = jnp.sum(acc_ref[...])


def opacity_err_unconstrained(rendered_silhouettes, alpha, *,
                              target_tile_bytes=TARGET_TILE_BYTES):
    """mean((s * (1 - s))**alpha) over all elements, computed in Pallas."""
    x = rendered_silhouettes
    n = x.size
    flat = x.reshape(-1)  # native dtype; no host-side f32 upcast copy

    # Keep only TPU-friendly float dtypes; everything else -> f32.
    if (not jnp.issubdtype(flat.dtype, jnp.floating)) or flat.dtype.itemsize > 4:
        flat = flat.astype(jnp.float32)

    rows = n // LANE
    tail = n - rows * LANE

    # Tail (< 128 elements) handled in plain JAX; empty for typical image sizes.
    if tail:
        ts = flat[rows * LANE:].astype(jnp.float32)
        tail_sum = jnp.sum(_apply_alpha(ts * (1.0 - ts), alpha))
    else:
        tail_sum = jnp.float32(0.0)

    if rows == 0:
        return tail_sum / jnp.float32(n)

    itemsize = jnp.dtype(flat.dtype).itemsize
    packing = 8 * max(1, 4 // itemsize)              # f32: 8, bf16/f16: 16
    row_align = packing if rows < ACC_ROWS else max(packing, ACC_ROWS)
    target_rows = max(row_align, int(target_tile_bytes) // (LANE * itemsize))
    br = min(target_rows, _round_up(rows, row_align))
    br = _round_up(br, row_align)
    acc_rows = min(ACC_ROWS, br)                     # divides br by construction

    # No-op view when n is a multiple of 128 (common for image tensors).
    slab = flat[: rows * LANE].reshape(rows, LANE)

    nb = pl.cdiv(rows, br)                           # total row-blocks
    num_splits = min(_num_core_splits(), nb) if nb >= 2 else 1
    blocks_per_core = pl.cdiv(nb, num_splits)

    if blocks_per_core * num_splits == nb:
        def x_index_map(c, i):                       # pure affine, no clamp
            return (c * blocks_per_core + i, 0)
    else:
        def x_index_map(c, i):                       # clamp fully-OOB blocks
            return (jnp.minimum(c * blocks_per_core + i, nb - 1), 0)

    native_math = (flat.dtype == jnp.bfloat16) and _has_bf16_valu()

    partials = pl.pallas_call(
        functools.partial(
            _opacity_sum_kernel,
            alpha=float(alpha),
            rows=rows,
            block_rows=br,
            blocks_per_core=blocks_per_core,
            acc_rows=acc_rows,
            native_math=native_math,
        ),
        out_shape=jax.ShapeDtypeStruct((num_splits, 1), jnp.float32),
        grid_spec=pltpu.PrefetchScalarGridSpec(
            num_scalar_prefetch=0,
            grid=(num_splits, blocks_per_core),
            in_specs=[pl.BlockSpec((br, LANE), x_index_map)],
            out_specs=pl.BlockSpec(
                (1, 1), lambda c, i: (c, 0), memory_space=pltpu.SMEM
            ),
            scratch_shapes=[pltpu.VMEM((acc_rows, LANE), jnp.float32)],
        ),
        compiler_params=pltpu.CompilerParams(
            dimension_semantics=("parallel", "arbitrary"),
            vmem_limit_bytes=32 * 1024 * 1024,
        ),
    )(slab)

    total = jnp.sum(partials) + tail_sum
    return total / jnp.float32(n)


class OpacityLoss:
    """JAX/Pallas port of pytorch3d_nerf OpacityLoss."""

    def __init__(self, alpha, start_factor, start_epoch, max_epochs):
        self.alpha = alpha
        self.start_factor = start_factor
        self.start_epoch = start_epoch
        self.max_epochs = max_epochs

    def __call__(self, rendered_silhouettes, current_epoch):
        err_unconstrained = opacity_err_unconstrained(
            rendered_silhouettes, self.alpha
        )
        # Epoch-schedule factor is pure Python scalar logic (same as PyTorch).
        if self.max_epochs > 0 and current_epoch > self.start_epoch:
            loss_factor = self.start_factor * max(
                0, 1 - current_epoch / (self.start_epoch + self.max_epochs)
            )
        else:
            loss_factor = 0
        err = err_unconstrained * loss_factor
        return (err, err_unconstrained, loss_factor)


if __name__ == "__main__":
    key = jax.random.PRNGKey(0)
    # Rendered silhouettes in [0, 1], NCHW-like shape.
    x = jax.random.uniform(key, (2, 4, 16, 16), dtype=jnp.float32)

    loss_mod = OpacityLoss(alpha=2.0, start_factor=0.5, start_epoch=2, max_epochs=10)
    current_epoch = 5

    err, err_unc, loss_factor = loss_mod(x, current_epoch)
    err = jax.block_until_ready(err)
    err_unc = jax.block_until_ready(err_unc)

    # Pure-JAX reference check (f32 input, single block, unmasked fast path).
    ref_unc = jnp.mean((x * (1.0 - x)) ** 2.0)
    ref_factor = 0.5 * max(0, 1 - current_epoch / (2 + 10))
    assert abs(float(err_unc) - float(ref_unc)) < 1e-6, (err_unc, ref_unc)
    assert abs(loss_factor - ref_factor) < 1e-12
    assert abs(float(err) - float(ref_unc) * ref_factor) < 1e-6

    # Ragged shape: exercises the ragged-block select mask + plain-JAX tail.
    x2 = jax.random.uniform(jax.random.PRNGKey(1), (2, 3, 17, 19), dtype=jnp.float32)
    got2 = jax.block_until_ready(opacity_err_unconstrained(x2, 2.0))
    ref2 = jnp.mean((x2 * (1.0 - x2)) ** 2.0)
    assert abs(float(got2) - float(ref2)) < 1e-6, (got2, ref2)

    # Multi-block grid (small tile override) with a ragged final block.
    x4 = jax.random.uniform(jax.random.PRNGKey(2), (4, 63, 64), dtype=jnp.float32)
    got4 = jax.block_until_ready(
        opacity_err_unconstrained(x4, 2.0, target_tile_bytes=32 * 1024)
    )
    ref4 = jnp.mean((x4 * (1.0 - x4)) ** 2.0)
    assert abs(float(got4) - float(ref4)) < 1e-5, (got4, ref4)

    # bf16 input: exercises the native-dtype streaming path (packed bf16 math
    # on v6e+, f32 in-kernel cast otherwise) -> loose tolerance.
    x3 = x.astype(jnp.bfloat16)
    got3 = jax.block_until_ready(opacity_err_unconstrained(x3, 2.0))
    x3f = x3.astype(jnp.float32)
    ref3 = jnp.mean((x3f * (1.0 - x3f)) ** 2.0)
    assert abs(float(got3) - float(ref3)) < 1e-3, (got3, ref3)

    print("KERNEL_OK")
</pallas_src>

<mosaic_0001>
module attributes {stable_mosaic.version = 11 : i64} {
  func.func @_opacity_sum_kernel(%arg0: i32, %arg1: i32, %arg2: memref<16x128xf32, #tpu.memory_space<vmem>>, %arg3: memref<1x1xf32, #tpu.memory_space<smem>>, %arg4: memref<16x128xf32, #tpu.memory_space<vmem>>) attributes {dimension_semantics = [#tpu.dimension_semantics<parallel>, #tpu.dimension_semantics<arbitrary>], iteration_bounds = array<i64: 1, 1>, scalar_prefetch = 0 : i64, scratch_operands = 1 : i64, tpu.core_type = #tpu.core_type<tc>, window_params = [{transform_indices = @transform_0, window_bounds = array<i64: 16, 128>}, {transform_indices = @transform_1, window_bounds = array<i64: 1, 1>}]} {
    %c0_i32 = arith.constant 0 : i32
    %0 = arith.cmpi eq, %arg1, %c0_i32 : i32
    %1 = arith.extui %0 : i1 to i32
    %c0_i32_0 = arith.constant 0 : i32
    %2 = arith.cmpi ne, %1, %c0_i32_0 : i32
    scf.if %2 {
      %cst_11 = arith.constant 0.000000e+00 : f32
      %24 = vector.broadcast %cst_11 : f32 to vector<16x128xf32>
      %c0_12 = arith.constant 0 : index
      %c0_13 = arith.constant 0 : index
      %25 = vector.load %arg4[%c0_12, %c0_13] : memref<16x128xf32, #tpu.memory_space<vmem>>, vector<16x128xf32>
      tpu.vector_store %arg4[%c0_12, %c0_13], %24 {strides = array<i32>} : memref<16x128xf32, #tpu.memory_space<vmem>>, vector<16x128xf32>,
    } else {
    }
    %c1_i32 = arith.constant 1 : i32
    %3 = arith.muli %arg0, %c1_i32 : i32
    %4 = arith.addi %3, %arg1 : i32
    %c16_i32 = arith.constant 16 : i32
    %5 = arith.muli %4, %c16_i32 : i32
    %c0 = arith.constant 0 : index
    %c0_1 = arith.constant 0 : index
    %6 = vector.load %arg2[%c0, %c0_1] : memref<16x128xf32, #tpu.memory_space<vmem>>, vector<16x128xf32>
    %cst = arith.constant 1.000000e+00 : f32
    %7 = vector.broadcast %cst : f32 to vector<16x128xf32>
    %8 = arith.subf %7, %6 : vector<16x128xf32>
    %9 = arith.mulf %6, %8 : vector<16x128xf32>
    %10 = arith.mulf %9, %9 : vector<16x128xf32>
    %c16_i32_2 = arith.constant 16 : i32
    %11 = arith.addi %5, %c16_i32_2 : i32
    %c16_i32_3 = arith.constant 16 : i32
    %12 = arith.cmpi sle, %11, %c16_i32_3 : i32
    %13 = arith.extui %12 : i1 to i32
    %c0_i32_4 = arith.constant 0 : i32
    %14 = arith.cmpi ne, %13, %c0_i32_4 : i32
    scf.if %14 {
      %c0_11 = arith.constant 0 : index
      %c0_12 = arith.constant 0 : index
      %24 = vector.load %arg4[%c0_11, %c0_12] : memref<16x128xf32, #tpu.memory_space<vmem>>, vector<16x128xf32>
      %25 = vector.shape_cast %10 : vector<16x128xf32> to vector<1x16x128xf32>
      %cst_13 = arith.constant dense<0.000000e+00> : vector<16x128xf32>
      %26 = vector.multi_reduction <add>, %25, %cst_13 [0] : vector<1x16x128xf32> to vector<16x128xf32>
      %27 = arith.addf %24, %26 : vector<16x128xf32>
      %c0_14 = arith.constant 0 : index
      %c0_15 = arith.constant 0 : index
      %28 = vector.load %arg4[%c0_14, %c0_15] : memref<16x128xf32, #tpu.memory_space<vmem>>, vector<16x128xf32>
      tpu.vector_store %arg4[%c0_14, %c0_15], %27 {strides = array<i32>} : memref<16x128xf32, #tpu.memory_space<vmem>>, vector<16x128xf32>,
    } else {
    }
    %c16_i32_5 = arith.constant 16 : i32
    %15 = arith.cmpi slt, %5, %c16_i32_5 : i32
    %c16_i32_6 = arith.constant 16 : i32
    %16 = arith.addi %5, %c16_i32_6 : i32
    %c16_i32_7 = arith.constant 16 : i32
    %17 = arith.cmpi sgt, %16, %c16_i32_7 : i32
    %18 = arith.andi %15, %17 : i1
    %19 = arith.extui %18 : i1 to i32
    %c0_i32_8 = arith.constant 0 : i32
    %20 = arith.cmpi ne, %19, %c0_i32_8 : i32
    scf.if %20 {
      %24 = tpu.iota {dimensions = array<i32: 0>} : vector<16x128xi32>
      %25 = vector.broadcast %5 : i32 to vector<16x128xi32>
      %26 = arith.addi %24, %25 : vector<16x128xi32>
      %c16_i32_11 = arith.constant 16 : i32
      %27 = vector.broadcast %c16_i32_11 : i32 to vector<16x128xi32>
      %28 = arith.cmpi slt, %26, %27 : vector<16x128xi32>
      %cst_12 = arith.constant 0.000000e+00 : f32
      %29 = vector.broadcast %cst_12 : f32 to vector<16x128xf32>
      %30 = arith.select %28, %10, %29 : vector<16x128xi1>, vector<16x128xf32>
      %c0_13 = arith.constant 0 : index
      %c0_14 = arith.constant 0 : index
      %31 = vector.load %arg4[%c0_13, %c0_14] : memref<16x128xf32, #tpu.memory_space<vmem>>, vector<16x128xf32>
      %32 = vector.shape_cast %30 : vector<16x128xf32> to vector<1x16x128xf32>
      %cst_15 = arith.constant dense<0.000000e+00> : vector<16x128xf32>
      %33 = vector.multi_reduction <add>, %32, %cst_15 [0] : vector<1x16x128xf32> to vector<16x128xf32>
      %34 = arith.addf %31, %33 : vector<16x128xf32>
      %c0_16 = arith.constant 0 : index
      %c0_17 = arith.constant 0 : index
      %35 = vector.load %arg4[%c0_16, %c0_17] : memref<16x128xf32, #tpu.memory_space<vmem>>, vector<16x128xf32>
      tpu.vector_store %arg4[%c0_16, %c0_17], %34 {strides = array<i32>} : memref<16x128xf32, #tpu.memory_space<vmem>>, vector<16x128xf32>,
    } else {
    }
    %c0_i32_9 = arith.constant 0 : i32
    %21 = arith.cmpi eq, %arg1, %c0_i32_9 : i32
    %22 = arith.extui %21 : i1 to i32
    %c0_i32_10 = arith.constant 0 : i32
    %23 = arith.cmpi ne, %22, %c0_i32_10 : i32
    scf.if %23 {
      %c0_11 = arith.constant 0 : index
      %c0_12 = arith.constant 0 : index
      %24 = vector.load %arg4[%c0_11, %c0_12] : memref<16x128xf32, #tpu.memory_space<vmem>>, vector<16x128xf32>
      %25 = vector.shape_cast %24 : vector<16x128xf32> to vector<1x16x128xf32>
      %cst_13 = arith.constant dense<0.000000e+00> : vector<1xf32>
      %26 = vector.multi_reduction <add>, %25, %cst_13 [1, 2] : vector<1x16x128xf32> to vector<1xf32>
      %27 = vector.shape_cast %26 : vector<1xf32> to vector<1x1x1xf32>
      %28 = vector.extract %27[0, 0, 0] : f32 from vector<1x1x1xf32>
      %c0_14 = arith.constant 0 : index
      %c0_15 = arith.constant 0 : index
      %29 = memref.load %arg3[%c0_14, %c0_15] : memref<1x1xf32, #tpu.memory_space<smem>>
      memref.store %28, %arg3[%c0_14, %c0_15] : memref<1x1xf32, #tpu.memory_space<smem>>
    } else {
    }
    return
  }
  func.func @transform_0(%arg0: i32, %arg1: i32) -> (i32, i32) {
    %c1_i32 = arith.constant 1 : i32
    %0 = arith.muli %arg0, %c1_i32 : i32
    %1 = arith.addi %0, %arg1 : i32
    %c0_i32 = arith.constant 0 : i32
    %c0_i32_0 = arith.constant 0 : i32
    return %1, %c0_i32 : i32, i32
  }
  func.func @transform_1(%arg0: i32, %arg1: i32) -> (i32, i32) {
    %c0_i32 = arith.constant 0 : i32
    %c0_i32_0 = arith.constant 0 : i32
    return %arg0, %c0_i32 : i32, i32
  }
}

</mosaic_0001>

<bundles_post_ra>
// kernel: tpu_custom_call.1
= control target key start
LH: loop header
LB: loop body
LE: loop exit
PB: predicated region body
PF: predicated region fallthrough
CT: control target
= control target key end

     0   :  { %6 = vsyncpa [#allocation4], 0  ;;  %s193_s0 = inlined_call_operand.hbm [shape: f32[16,128], index: 0, kind: input, shape index: {}]   ;;  %s194_s1 = inlined_call_operand.hbm [shape: f32[1,1], index: 1, kind: output, shape index: {}]  }
   0x1   :  { %7 = vsyncpa [#allocation5], 0  ;;  %s155_s6 = smov [#allocation3]   ;;  %s119_s10 = scalar_lea.hbm %s193_s0, 256 }
   0x2   :  { %s17_s7 = sshll.u32 %s155_s6, 4  ;;  %p120_p0 = scmp.ne.s32.totalorder %s193_s0, %s119_s10  ;;  %s18_s7 = int_to_ptr.vmem [resolvable:$true] %s17_s7 }
   0x3   :  { %p123_p1 = scmp.lt.u32.totalorder %s119_s10, %s193_s0 }
   0x5   :  { %p125_p2 = pnand %p123_p1, %p120_p0 }
   0x7   :  { %128 = shalt.err (!%p125_p2)
}
   0x8   :  { %s129_s15 = scalar_lea.vmem %s18_s7, 256  ;;  %p134_p4 = scmp.lt.s32.totalorder %s18_s7, %s18_s7 }
   0x9   :  { %p130_p3 = scmp.ne.s32.totalorder %s18_s7, %s129_s15  ;;  %p135_p5 = scmp.lt.s32.totalorder %s129_s15, %s129_s15 }
   0xb   :  { %p136_p6 = por %p135_p5, %p134_p4 }
   0xd   :  { %p137_p7 = pnand %p136_p6, %p130_p3 }
   0xf   :  { %140 = shalt.err (!%p137_p7)
}
  0x10   :  { %s156_s16 = smov 128   ;;  %s157_s17 = smov 8  }
  0x11   :  { %23 = dma.hbm_to_vmem [thread:$0]  %s193_s0, 256, %s18_s7, [#allocation4], %s156_s16, %s156_s16, %s157_s17  }
  0x12   :  { %151 = dma.done.wait [#allocation4], 256  }
  0x13   :  { %152 = vsyncadd [#allocation4], 4294967040  ;;  %v37_v0 = vld [vmem:[#allocation3] sm:$0xff]  ;;  %v38_v1 = vld [vmem:[#allocation3 + $0x8] sm:$0xff]  ;;  %s141_s22 = scalar_lea.hbm %s194_s1, 16 }
  0x14   :  { %v39_v2 = vsub.f32 1.0, %v37_v0  ;;  %v40_v3 = vsub.f32 1.0, %v38_v1  ;;  %p142_p8 = scmp.ne.s32.totalorder %s194_s1, %s141_s22  ;;  %p145_p9 = scmp.lt.u32.totalorder %s141_s22, %s194_s1 }
  0x16   :  { %v41_v4 = vmul.f32 %v39_v2, %v37_v0  ;;  %v42_v5 = vmul.f32 %v40_v3, %v38_v1  ;;  %p147_p10 = pnand %p145_p9, %p142_p8 }
  0x18   :  { %v43_v6 = vmul.f32 %v41_v4, %v41_v4  ;;  %v44_v7 = vmul.f32 %v42_v5, %v42_v5 }
  0x1a   :  { %v87_v8 = vadd.f32 %v44_v7, %v43_v6 }
  0x1c   :  { %88 = vadd.xlane.f32.xlu0 %v87_v8 }
  0xa9   :  { %v89_v9 = vpop.xlane.xlu0 %88 }
  0xaa   :  { %v90_v10 = vrot.slane %v89_v9, 4 }
  0xac   :  { %v91_v11 = vadd.f32 %v90_v10, %v89_v9 }
  0xae   :  { %v92_v12 = vrot.slane %v91_v11, 2 }
  0xb0   :  { %v93_v13 = vadd.f32 %v92_v12, %v91_v11 }
  0xb2   :  { %v94_v14 = vrot.slane %v93_v13, 1 }
  0xb4   :  { %v95_v15 = vadd.f32 %v94_v14, %v93_v13 }
  0xb6   :  { %113 = vpush %v95_v15 }
  0xe7   :  { %s114_s0 = spop %113 }
  0xe8   :  { %98 = sst [smem:[#allocation6]] %s114_s0 }
  0xe9   :  { %150 = shalt.err (!%p147_p10)
}
  0xea   :  { %s158_s27 = smov [#allocation6]  }
  0xeb   :  { %106 = dma.smem_to_hbm %s158_s27, 16, %s194_s1, [#allocation5]  }
  0xec   :  { %153 = dma.done.wait [#allocation5], 16  }
  0xed   :  { %154 = vsyncadd [#allocation5], 4294967280 }
  0xee   :  { %110 = sfence }
  0xef   :  { %111 = vsyncpa [#allocation4], 1 }
  0xf0   :  { %112 = vsyncpa [#allocation5], 1 }

</bundles_post_ra>
